<compile_context>
chip_gen: v5e
topology: v5e:2x2
jax: 0.10.0
libtpu: 0.0.40
codegen_flags: <defaults>
</compile_context>

<pallas_src>
import functools

import jax
import jax.numpy as jnp
from jax.experimental import pallas as pl
from jax.experimental.pallas import tpu as pltpu

D_MODEL = 128
NUM_EXPERT = 4
TOP_K = 2
WORLD_SIZE = 1

_ROW_ALIGN = 16       # sublane alignment safe for both bf16 (16) and f32 (8) tiles
_TM_TARGET = 1024     # token-tile target (512 -> ~85%, 1024 -> ~86% of HBM roofline)


# ---------------- Pallas kernel ----------------

def _fmoe_fused_kernel(x_ref, wg_ref, bg_ref, wall_ref, be_ref, o_ref, *,
                       num_expert, top_k, d_model):
    """One token tile per grid step; gate + top-k + softmax + experts fused.

    x_ref    : (tm, D)    bf16/f32  token tile (streamed)
    wg_ref   : (D, E)     f32       gate weight        (VMEM resident)
    bg_ref   : (1, E)     f32       gate bias          (VMEM resident)
    wall_ref : (D, E*D)   bf16      fused expert weights, column block e == W_e
    be_ref   : (E, D)     f32       expert biases      (VMEM resident)
    o_ref    : (tm, D)    same dtype as input
    """
    x = x_ref[...]
    xf = x.astype(jnp.float32)

    # ---- NaiveGate: logits -> top-k -> softmax over the selected scores ----
    logits = (jnp.dot(xf, wg_ref[...], preferred_element_type=jnp.float32)
              + bg_ref[...])                                          # (tm, E)
    eidx = jax.lax.broadcasted_iota(jnp.int32, logits.shape, 1)       # (tm, E)

    sel = []                                                          # [(max, onehot)]
    work = logits
    for _ in range(top_k):
        m = jnp.max(work, axis=-1, keepdims=True)                     # (tm, 1)
        first = jnp.min(jnp.where(work == m, eidx, num_expert),
                        axis=-1, keepdims=True)                       # lowest-idx tie break
        oh = (eidx == first).astype(jnp.float32)                      # (tm, E)
        sel.append((m, oh))
        work = jnp.where(oh > 0.0, -jnp.inf, work)

    # Softmax over the K selected logits, column-wise (no concatenate):
    #   p_0 = exp(0) = 1 (top-1 is the running max), p_k = exp(m_k - m_0).
    m0 = sel[0][0]
    rest = [jnp.exp(m - m0) for m, _ in sel[1:]]
    denom = jnp.ones_like(m0)
    for p in rest:
        denom = denom + p
    if top_k > 1:
        inv = pl.reciprocal(denom, approx=True)                       # (tm, 1)
    else:
        inv = jnp.ones_like(denom)
    gate_dense = sel[0][1] * inv                                      # (tm, E)
    for (_, oh), p in zip(sel[1:], rest):
        gate_dense = gate_dense + oh * (p * inv)

    # ---- experts: one wide (tm,D)@(D,E*D) bf16 MXU matmul --------------------
    xb = x.astype(jnp.bfloat16)
    y = jnp.dot(xb, wall_ref[...], preferred_element_type=jnp.float32)  # (tm, E*D)

    # expert biases as one tiny matmul: sum_e gate[n,e] * b_e (MXU has slack)
    acc = jnp.dot(gate_dense, be_ref[...], preferred_element_type=jnp.float32)
    for e in range(num_expert):                                       # 128-aligned slices
        acc = acc + gate_dense[:, e:e + 1] * y[:, e * d_model:(e + 1) * d_model]
    o_ref[...] = acc.astype(o_ref.dtype)


# ---------------- wrapper ----------------

def _num_tensorcores():
    """Best-effort TensorCore count of device 0 (2 on v7x, 1 on v5e/v6e)."""
    try:
        return max(1, int(getattr(jax.devices()[0], "num_cores", 1)))
    except Exception:
        return 1


def _round_up(x, m):
    return (x + m - 1) // m * m


def _pick_tm(n_tokens, n_cores):
    """Largest row tile <= _TM_TARGET; only force >=2 tiles on multi-TC parts."""
    if n_cores > 1:
        rows = _round_up(pl.cdiv(n_tokens, n_cores), _ROW_ALIGN)
    else:
        rows = _round_up(n_tokens, _ROW_ALIGN)
    return max(_ROW_ALIGN, min(_TM_TARGET, rows))


def prepare_fmoe_params(params):
    """One-time parameter prep: bf16 cast + expert-weight fusion (not per call)."""
    we = params["we"]                                   # (E, D, D); y_e = x @ W_e
    E, D, _ = we.shape
    # wall[:, e*D:(e+1)*D] == W_e  -> x @ wall gives all experts in one matmul.
    wall = jnp.transpose(we, (1, 0, 2)).reshape(D, E * D).astype(jnp.bfloat16)
    return {
        "wg": params["wg"].astype(jnp.float32),                     # (D, E)
        "bg": params["bg"].reshape(1, E).astype(jnp.float32),       # (1, E)
        "wall": wall,                                               # (D, E*D) bf16
        "be": params["be"].reshape(E, D).astype(jnp.float32),       # (E, D)
    }


def fmoe_forward(inp, kparams, *, top_k=TOP_K, tm=None):
    N, D = inp.shape
    E = kparams["wg"].shape[1]

    if tm is None:
        tm = _pick_tm(N, _num_tensorcores())
    n_tiles = pl.cdiv(N, tm)
    n_pad = n_tiles * tm
    x = inp if n_pad == N else jnp.pad(inp, ((0, n_pad - N), (0, 0)))

    kernel = functools.partial(_fmoe_fused_kernel,
                               num_expert=E, top_k=top_k, d_model=D)

    out = pl.pallas_call(
        kernel,
        out_shape=jax.ShapeDtypeStruct((n_pad, D), inp.dtype),
        grid=(n_tiles,),
        in_specs=[
            pl.BlockSpec((tm, D), lambda i: (i, 0)),          # token tile (streamed)
            pl.BlockSpec((D, E), lambda i: (0, 0)),           # gate W   (resident)
            pl.BlockSpec((1, E), lambda i: (0, 0)),           # gate b   (resident)
            pl.BlockSpec((D, E * D), lambda i: (0, 0)),       # fused expert W (resident)
            pl.BlockSpec((E, D), lambda i: (0, 0)),           # expert biases  (resident)
        ],
        out_specs=pl.BlockSpec((tm, D), lambda i: (i, 0)),
        compiler_params=pltpu.CompilerParams(
            dimension_semantics=("parallel",),
            vmem_limit_bytes=32 * 1024 * 1024),                # headroom for tm=1024 on v5e
    )(x, kparams["wg"], kparams["bg"], kparams["wall"], kparams["be"])

    return out[:N]


# ---------------- main ----------------

if __name__ == "__main__":
    key = jax.random.PRNGKey(0)
    kx, kwg, kbg, kwe, kbe = jax.random.split(key, 5)

    batch, seq = 2, 8
    N = batch * seq                                    # tokens (FMoE input is 2-D)
    # bf16 activations at the module boundary (halves the HBM token stream);
    # the kernel upcasts to f32 in-kernel for the gate so top-k matches the ref.
    inp = jax.random.normal(kx, (N, D_MODEL), dtype=jnp.float32).astype(jnp.bfloat16)

    bound = 1.0 / (D_MODEL ** 0.5)                     # torch nn.Linear default init range
    params = {
        "wg": jax.random.uniform(kwg, (D_MODEL, NUM_EXPERT * WORLD_SIZE),
                                 jnp.float32, -bound, bound),
        "bg": jax.random.uniform(kbg, (NUM_EXPERT * WORLD_SIZE,),
                                 jnp.float32, -bound, bound),
        "we": jax.random.uniform(kwe, (NUM_EXPERT, D_MODEL, D_MODEL),
                                 jnp.float32, -bound, bound),
        "be": jax.random.uniform(kbe, (NUM_EXPERT, D_MODEL),
                                 jnp.float32, -bound, bound),
    }
    kparams = prepare_fmoe_params(params)              # one-time bf16 cast + fuse

    fwd = jax.jit(fmoe_forward)
    out = jax.block_until_ready(fwd(inp, kparams))

    # plain-JAX f32 reference of the sparse-dispatch + final bmm semantics
    xf = inp.astype(jnp.float32)
    logits_ref = xf @ params["wg"] + params["bg"][None, :]
    tv, ti = jax.lax.top_k(logits_ref, TOP_K)
    sc = jax.nn.softmax(tv, axis=-1)
    expert_out = jnp.einsum("nd,edh->enh", xf, params["we"]) + params["be"][:, None, :]
    ref = jnp.zeros((N, D_MODEL), jnp.float32)
    for k in range(TOP_K):
        ref = ref + sc[:, k:k + 1] * expert_out[ti[:, k], jnp.arange(N), :]

    assert out.shape == (N, D_MODEL)
    out_f32 = out.astype(jnp.float32)
    # bf16 token I/O + bf16 expert matmul (f32 accumulation) vs f32 reference
    assert jnp.allclose(out_f32, ref, rtol=3e-2, atol=3e-2), (
        float(jnp.max(jnp.abs(out_f32 - ref))))
    print("KERNEL_OK")
</pallas_src>

<mosaic_0001>
module attributes {stable_mosaic.version = 11 : i64} {
  func.func @_fmoe_fused_kernel(%arg0: i32, %arg1: memref<16x128xbf16, #tpu.memory_space<vmem>>, %arg2: memref<128x4xf32, #tpu.memory_space<vmem>>, %arg3: memref<1x4xf32, #tpu.memory_space<vmem>>, %arg4: memref<128x512xbf16, #tpu.memory_space<vmem>>, %arg5: memref<4x128xf32, #tpu.memory_space<vmem>>, %arg6: memref<16x128xbf16, #tpu.memory_space<vmem>>) attributes {dimension_semantics = [#tpu.dimension_semantics<parallel>], iteration_bounds = array<i64: 1>, scalar_prefetch = 0 : i64, scratch_operands = 0 : i64, tpu.core_type = #tpu.core_type<tc>, window_params = [{transform_indices = @transform_0, window_bounds = array<i64: 16, 128>}, {pipeline_mode = #tpu.pipeline_mode<synchronous>, transform_indices = @transform_1, window_bounds = array<i64: 128, 4>}, {pipeline_mode = #tpu.pipeline_mode<synchronous>, transform_indices = @transform_2, window_bounds = array<i64: 1, 4>}, {pipeline_mode = #tpu.pipeline_mode<synchronous>, transform_indices = @transform_3, window_bounds = array<i64: 128, 512>}, {pipeline_mode = #tpu.pipeline_mode<synchronous>, transform_indices = @transform_4, window_bounds = array<i64: 4, 128>}, {transform_indices = @transform_5, window_bounds = array<i64: 16, 128>}]} {
    %c0 = arith.constant 0 : index
    %c0_0 = arith.constant 0 : index
    %0 = vector.load %arg1[%c0, %c0_0] : memref<16x128xbf16, #tpu.memory_space<vmem>>, vector<16x128xbf16>
    %1 = arith.extf %0 : vector<16x128xbf16> to vector<16x128xf32>
    %c0_1 = arith.constant 0 : index
    %c0_2 = arith.constant 0 : index
    %2 = vector.load %arg2[%c0_1, %c0_2] : memref<128x4xf32, #tpu.memory_space<vmem>>, vector<128x4xf32>
    %cst = arith.constant dense<0.000000e+00> : vector<16x4xf32>
    %3 = tpu.matmul %1, %2, %cst {dimension_numbers = #tpu.dot_dimension_numbers<[1], [0], [0], [1], [0, 0, 1, 1], [], []>} : vector<16x128xf32>, vector<128x4xf32>, vector<16x4xf32> -> vector<16x4xf32>
    %c0_3 = arith.constant 0 : index
    %c0_4 = arith.constant 0 : index
    %4 = vector.load %arg3[%c0_3, %c0_4] : memref<1x4xf32, #tpu.memory_space<vmem>>, vector<1x4xf32>
    %5 = vector.broadcast %4 : vector<1x4xf32> to vector<16x4xf32>
    %6 = arith.addf %3, %5 : vector<16x4xf32>
    %7 = tpu.iota {dimensions = array<i32: 1>} : vector<16x4xi32>
    %cst_5 = arith.constant dense<0xFF800000> : vector<16xf32>
    %8 = vector.multi_reduction <maximumf>, %6, %cst_5 [1] : vector<16x4xf32> to vector<16xf32>
    %9 = vector.shape_cast %8 : vector<16xf32> to vector<16x1xf32>
    %10 = vector.broadcast %9 : vector<16x1xf32> to vector<16x4xf32>
    %11 = arith.cmpf oeq, %6, %10 : vector<16x4xf32>
    %c4_i32 = arith.constant 4 : i32
    %12 = vector.broadcast %c4_i32 : i32 to vector<16x4xi32>
    %13 = arith.select %11, %7, %12 : vector<16x4xi1>, vector<16x4xi32>
    %cst_6 = arith.constant dense<2147483647> : vector<16xi32>
    %14 = vector.multi_reduction <minsi>, %13, %cst_6 [1] : vector<16x4xi32> to vector<16xi32>
    %15 = vector.shape_cast %14 : vector<16xi32> to vector<16x1xi32>
    %16 = vector.broadcast %15 : vector<16x1xi32> to vector<16x4xi32>
    %17 = arith.cmpi eq, %7, %16 : vector<16x4xi32>
    %18 = arith.extui %17 : vector<16x4xi1> to vector<16x4xi32>
    %19 = arith.sitofp %18 : vector<16x4xi32> to vector<16x4xf32>
    %cst_7 = arith.constant 0.000000e+00 : f32
    %20 = vector.broadcast %cst_7 : f32 to vector<16x4xf32>
    %21 = arith.cmpf ogt, %19, %20 : vector<16x4xf32>
    %cst_8 = arith.constant 0xFF800000 : f32
    %22 = vector.broadcast %cst_8 : f32 to vector<16x4xf32>
    %23 = arith.select %21, %22, %6 : vector<16x4xi1>, vector<16x4xf32>
    %cst_9 = arith.constant dense<0xFF800000> : vector<16xf32>
    %24 = vector.multi_reduction <maximumf>, %23, %cst_9 [1] : vector<16x4xf32> to vector<16xf32>
    %25 = vector.shape_cast %24 : vector<16xf32> to vector<16x1xf32>
    %26 = vector.broadcast %25 : vector<16x1xf32> to vector<16x4xf32>
    %27 = arith.cmpf oeq, %23, %26 : vector<16x4xf32>
    %c4_i32_10 = arith.constant 4 : i32
    %28 = vector.broadcast %c4_i32_10 : i32 to vector<16x4xi32>
    %29 = arith.select %27, %7, %28 : vector<16x4xi1>, vector<16x4xi32>
    %cst_11 = arith.constant dense<2147483647> : vector<16xi32>
    %30 = vector.multi_reduction <minsi>, %29, %cst_11 [1] : vector<16x4xi32> to vector<16xi32>
    %31 = vector.shape_cast %30 : vector<16xi32> to vector<16x1xi32>
    %32 = vector.broadcast %31 : vector<16x1xi32> to vector<16x4xi32>
    %33 = arith.cmpi eq, %7, %32 : vector<16x4xi32>
    %34 = arith.extui %33 : vector<16x4xi1> to vector<16x4xi32>
    %35 = arith.sitofp %34 : vector<16x4xi32> to vector<16x4xf32>
    %36 = arith.subf %25, %9 : vector<16x1xf32>
    %37 = math.exp %36 : vector<16x1xf32>
    %cst_12 = arith.constant 1.000000e+00 : f32
    %38 = vector.broadcast %cst_12 : f32 to vector<16x1xf32>
    %39 = arith.addf %38, %37 : vector<16x1xf32>
    %40 = tpu.reciprocal %39 {approx = true} : vector<16x1xf32> -> vector<16x1xf32>
    %41 = vector.broadcast %40 : vector<16x1xf32> to vector<16x4xf32>
    %42 = arith.mulf %19, %41 : vector<16x4xf32>
    %43 = arith.mulf %37, %40 : vector<16x1xf32>
    %44 = vector.broadcast %43 : vector<16x1xf32> to vector<16x4xf32>
    %45 = arith.mulf %35, %44 : vector<16x4xf32>
    %46 = arith.addf %42, %45 : vector<16x4xf32>
    %c0_13 = arith.constant 0 : index
    %c0_14 = arith.constant 0 : index
    %47 = vector.load %arg4[%c0_13, %c0_14] : memref<128x512xbf16, #tpu.memory_space<vmem>>, vector<128x512xbf16>
    %cst_15 = arith.constant dense<0.000000e+00> : vector<16x512xf32>
    %48 = tpu.matmul %0, %47, %cst_15 {dimension_numbers = #tpu.dot_dimension_numbers<[1], [0], [0], [1], [0, 0, 1, 1], [], []>} : vector<16x128xbf16>, vector<128x512xbf16>, vector<16x512xf32> -> vector<16x512xf32>
    %c0_16 = arith.constant 0 : index
    %c0_17 = arith.constant 0 : index
    %49 = vector.load %arg5[%c0_16, %c0_17] : memref<4x128xf32, #tpu.memory_space<vmem>>, vector<4x128xf32>
    %cst_18 = arith.constant dense<0.000000e+00> : vector<16x128xf32>
    %50 = tpu.matmul %46, %49, %cst_18 {dimension_numbers = #tpu.dot_dimension_numbers<[1], [0], [0], [1], [0, 0, 1, 1], [], []>} : vector<16x4xf32>, vector<4x128xf32>, vector<16x128xf32> -> vector<16x128xf32>
    %51 = vector.extract_strided_slice %46 {offsets = [0, 0], sizes = [16, 1], strides = [1, 1]} : vector<16x4xf32> to vector<16x1xf32>
    %52 = vector.extract_strided_slice %48 {offsets = [0, 0], sizes = [16, 128], strides = [1, 1]} : vector<16x512xf32> to vector<16x128xf32>
    %53 = vector.broadcast %51 : vector<16x1xf32> to vector<16x128xf32>
    %54 = arith.mulf %53, %52 : vector<16x128xf32>
    %55 = arith.addf %50, %54 : vector<16x128xf32>
    %56 = vector.extract_strided_slice %46 {offsets = [0, 1], sizes = [16, 1], strides = [1, 1]} : vector<16x4xf32> to vector<16x1xf32>
    %57 = vector.extract_strided_slice %48 {offsets = [0, 128], sizes = [16, 128], strides = [1, 1]} : vector<16x512xf32> to vector<16x128xf32>
    %58 = vector.broadcast %56 : vector<16x1xf32> to vector<16x128xf32>
    %59 = arith.mulf %58, %57 : vector<16x128xf32>
    %60 = arith.addf %55, %59 : vector<16x128xf32>
    %61 = vector.extract_strided_slice %46 {offsets = [0, 2], sizes = [16, 1], strides = [1, 1]} : vector<16x4xf32> to vector<16x1xf32>
    %62 = vector.extract_strided_slice %48 {offsets = [0, 256], sizes = [16, 128], strides = [1, 1]} : vector<16x512xf32> to vector<16x128xf32>
    %63 = vector.broadcast %61 : vector<16x1xf32> to vector<16x128xf32>
    %64 = arith.mulf %63, %62 : vector<16x128xf32>
    %65 = arith.addf %60, %64 : vector<16x128xf32>
    %66 = vector.extract_strided_slice %46 {offsets = [0, 3], sizes = [16, 1], strides = [1, 1]} : vector<16x4xf32> to vector<16x1xf32>
    %67 = vector.extract_strided_slice %48 {offsets = [0, 384], sizes = [16, 128], strides = [1, 1]} : vector<16x512xf32> to vector<16x128xf32>
    %68 = vector.broadcast %66 : vector<16x1xf32> to vector<16x128xf32>
    %69 = arith.mulf %68, %67 : vector<16x128xf32>
    %70 = arith.addf %65, %69 : vector<16x128xf32>
    %71 = arith.truncf %70 : vector<16x128xf32> to vector<16x128xbf16>
    %c0_19 = arith.constant 0 : index
    %c0_20 = arith.constant 0 : index
    %72 = vector.load %arg6[%c0_19, %c0_20] : memref<16x128xbf16, #tpu.memory_space<vmem>>, vector<16x128xbf16>
    tpu.vector_store %arg6[%c0_19, %c0_20], %71 {strides = array<i32>} : memref<16x128xbf16, #tpu.memory_space<vmem>>, vector<16x128xbf16>,
    return
  }
  func.func @transform_0(%arg0: i32) -> (i32, i32) {
    %c0_i32 = arith.constant 0 : i32
    %c0_i32_0 = arith.constant 0 : i32
    return %arg0, %c0_i32 : i32, i32
  }
  func.func @transform_1(%arg0: i32) -> (i32, i32) {
    %c0_i32 = arith.constant 0 : i32
    %c0_i32_0 = arith.constant 0 : i32
    %c0_i32_1 = arith.constant 0 : i32
    return %c0_i32, %c0_i32_0 : i32, i32
  }
  func.func @transform_2(%arg0: i32) -> (i32, i32) {
    %c0_i32 = arith.constant 0 : i32
    %c0_i32_0 = arith.constant 0 : i32
    %c0_i32_1 = arith.constant 0 : i32
    return %c0_i32, %c0_i32_0 : i32, i32
  }
  func.func @transform_3(%arg0: i32) -> (i32, i32) {
    %c0_i32 = arith.constant 0 : i32
    %c0_i32_0 = arith.constant 0 : i32
    %c0_i32_1 = arith.constant 0 : i32
    return %c0_i32, %c0_i32_0 : i32, i32
  }
  func.func @transform_4(%arg0: i32) -> (i32, i32) {
    %c0_i32 = arith.constant 0 : i32
    %c0_i32_0 = arith.constant 0 : i32
    %c0_i32_1 = arith.constant 0 : i32
    return %c0_i32, %c0_i32_0 : i32, i32
  }
  func.func @transform_5(%arg0: i32) -> (i32, i32) {
    %c0_i32 = arith.constant 0 : i32
    %c0_i32_0 = arith.constant 0 : i32
    return %arg0, %c0_i32 : i32, i32
  }
}

</mosaic_0001>

<bundles_post_ra>
// kernel: fmoe_forward.1
= control target key start
LH: loop header
LB: loop body
LE: loop exit
PB: predicated region body
PF: predicated region fallthrough
CT: control target
= control target key end

     0   :  { %10 = vsyncpa [#allocation3], 0  ;;  %s993_s0 = inlined_call_operand.vmem [shape: bf16[16,128], index: 0, kind: input, shape index: {}]   ;;  %s994_s1 = inlined_call_operand.vmem [shape: f32[128,4], index: 1, kind: input, shape index: {}]   ;;  %s995_s2 = inlined_call_operand.vmem [shape: f32[1,4], index: 2, kind: input, shape index: {}]   ;;  %s996_s3 = inlined_call_operand.hbm [shape: bf16[128,512], index: 3, kind: input, shape index: {}]   ;;  %s997_s4 = inlined_call_operand.vmem [shape: f32[4,128], index: 4, kind: input, shape index: {}]   ;;  %s998_s5 = inlined_call_operand.hbm [shape: bf16[16,128], index: 5, kind: output, shape index: {}]  }
   0x1   :  { %11 = vsyncpa [#allocation4], 0  ;;  %s22_s20 = sshll.u32 %s996_s3, 4  ;;  %s814_s21 = smov [#allocation2]   ;;  %s23_s20 = int_to_ptr.hbm [resolvable:$true] %s22_s20 }
   0x2   :  { %s24_s22 = sshll.u32 %s814_s21, 4  ;;  %s815_s23 = smov 256   ;;  %s25_s22 = int_to_ptr.vmem [resolvable:$true] %s24_s22 }
   0x3   :  { %s816_s24 = smov 16  }
   0x4   :  { %30 = dma.hbm_to_vmem [thread:$0]  %s23_s20, 4096, %s25_s22, [#allocation3], %s815_s23, %s815_s23, %s816_s24  }
   0x5   :  { %810 = dma.done.wait [#allocation3], 4096  }
   0x6   :  { %811 = vsyncadd [#allocation3], 4294963200  ;;  %v56_v0 = vld [vmem:[%s994_s1 + $0x78] sm:$0xff]  ;;  %v55_v1 = vld [vmem:[%s994_s1 + $0x70] sm:$0xff]  ;;  %vm86_vm0 = vcmask 31744   ;;  %v84_v26 = vlaneseq  ;;  %v817_v52 = vmov 0.0  }
   0x7   :  { %61 = vmatpush.msra.mxu0 %v56_v0  ;;  %v54_v2 = vld [vmem:[%s994_s1 + $0x68] sm:$0xff]  ;;  %v53_v3 = vld [vmem:[%s994_s1 + $0x60] sm:$0xff]  ;;  %v52_v4 = vld [vmem:[%s994_s1 + $0x58] sm:$0xff]  ;;  %vm472_vm13 = vcmask 1043456   ;;  %s545_s13 = sshll.u32 %s998_s5, 4  ;;  %s823_s14 = smov 64   ;;  %s546_s13 = int_to_ptr.hbm [resolvable:$true] %s545_s13 }
   0x8   :  { %v51_v5 = vld [vmem:[%s994_s1 + $0x50] sm:$0xff]  ;;  %v50_v6 = vld [vmem:[%s994_s1 + $0x48] sm:$0xff]  ;;  %v49_v7 = vld [vmem:[%s994_s1 + $0x40] sm:$0xff]  ;;  %v914_v27 = vand.u32 127, %v84_v26  ;;  %s824_s15 = smov 4  }
   0x9   :  { %62 = vmatpush.msra.mxu0 %v55_v1  ;;  %v48_v8 = vld [vmem:[%s994_s1 + $0x38] sm:$0xff]  ;;  %v47_v9 = vld [vmem:[%s994_s1 + $0x30] sm:$0xff]  ;;  %v46_v10 = vld [vmem:[%s994_s1 + $0x28] sm:$0xff] }
   0xa   :  { %v45_v11 = vld [vmem:[%s994_s1 + $0x20] sm:$0xff]  ;;  %v44_v12 = vld [vmem:[%s994_s1 + $0x18] sm:$0xff]  ;;  %v43_v13 = vld [vmem:[%s994_s1 + $0x10] sm:$0xff] }
   0xb   :  { %63 = vmatpush.msra.mxu0 %v54_v2  ;;  %v37_v14 = vld [vmem:[%s993_s0] sm:$0xff]   ;;  %v42_v15 = vld [vmem:[%s994_s1 + $0x8] sm:$0xff] }
   0xc   :  { %v41_v16 = vld [vmem:[%s994_s1] sm:$0xff]  ;;  %v39_v17 = vunpack.c.l.bf16 %v37_v14  ;;  %v40_v18 = vunpack.c.h.bf16 %v37_v14  ;;  %v688_v14 = vld [vmem:[#allocation2 + $0xe8] sm:$0xf] }
   0xd   :  { %64 = vmatpush.msra.mxu0 %v53_v3  ;;  %v753_v19 = vld [vmem:[%s995_s2] ss:$0 sm:$0xff]  ;;  %v656_v26 = vld [vmem:[#allocation2 + $0xa8] sm:$0xf] }
   0xf   :  { %65 = vmatpush.msra.mxu0 %v52_v4 }
  0x11   :  { %66 = vmatpush.msra.mxu0 %v51_v5 }
  0x13   :  { %67 = vmatpush.msra.mxu0 %v50_v6 }
  0x15   :  { %68 = vmatpush.msra.mxu0 %v49_v7 }
  0x17   :  { %69 = vmatpush.msra.mxu0 %v48_v8 }
  0x19   :  { %70 = vmatpush.msra.mxu0 %v47_v9  ;;  %v726_v9 = vld [vmem:[#allocation2 + $0xe4] sm:$0xf] }
  0x1b   :  { %71 = vmatpush.msra.mxu0 %v46_v10  ;;  %v682_v10 = vld [vmem:[#allocation2 + $0xf0] sm:$0xf0] }
  0x1d   :  { %72 = vmatpush.msra.mxu0 %v45_v11  ;;  %v722_v11 = vld [vmem:[#allocation2 + $0xc4] sm:$0xf] }
  0x1f   :  { %73 = vmatpush.msra.mxu0 %v44_v12  ;;  %v685_v12 = vor.u32 %v726_v9, %v682_v10  ;;  %v616_v10 = vld [vmem:[#allocation2 + $0x60] sm:$0xf] }
  0x21   :  { %74 = vmatpush.msra.mxu0 %v43_v13  ;;  %v666_v13 = vld [vmem:[#allocation2 + $0xd0] sm:$0xf0]  ;;  %413 = vmatpush.bf16.msra.mxu2 %v685_v12  ;;  %v608_v12 = vld [vmem:[#allocation2 + $0x48] sm:$0xf] }
  0x23   :  { %75 = vmatpush.msra.mxu0 %v42_v15  ;;  %v729_v15 = vld [vmem:[#allocation2 + $0xf4] sm:$0xf0] }
  0x25   :  { %76 = vmatpush.msra.mxu0 %v41_v16  ;;  %v669_v16 = vor.u32 %v722_v11, %v666_v13  ;;  %v712_v11 = vld [vmem:[#allocation2 + $0x6c] sm:$0xf0]  ;;  %v709_v13 = vld [vmem:[#allocation2 + $0x54] sm:$0xf0] }
  0x26   :  { %77 = vmatmul.f32.vlgmr.msra.gmra.mxu0 %v39_v17  ;;  %v689_v17 = vor.u32 %v729_v15, %v688_v14  ;;  %v702_v15 = vld [vmem:[#allocation2 + $0x24] sm:$0xf] }
  0x27   :  { %414 = vmatpush.bf16.msra.mxu2 %v669_v16 }
  0x28   :  { %427 = vmatpush.bf16.msra.mxu3 %v689_v17  ;;  %v586_v17 = vld [vmem:[#allocation2 + $0x30] sm:$0xf0] }
  0x2e   :  { %80 = vmatmul.f32.gmra.mxu0 %v40_v18  ;;  %v672_v18 = vld [vmem:[#allocation2 + $0xc8] sm:$0xf] }
  0xa3   :  { %v78_v20 = vpop.f32.mrf.mxu0 }
  0xa4   :  { %v79_v21 = vadd.f32 %v753_v19, %v78_v20  ;;  %v718_v20 = vld [vmem:[#allocation2 + $0xa4] sm:$0xf] }
  0xa6   :  { %v87_v22 = vsel %vm86_vm0, %v79_v21, -inf }
  0xa7   :  { %88 = vmax.xlane.f32.xlu0 %v87_v22  ;;  %v680_v22 = vld [vmem:[#allocation2 + $0xe0] sm:$0xf] }
  0xab   :  { %v81_v23 = vpop.f32.mrf.mxu0 }
  0xac   :  { %v82_v24 = vadd.f32 %v753_v19, %v81_v23  ;;  %v725_v19 = vld [vmem:[#allocation2 + $0xd4] sm:$0xf0] }
  0xad   :  { %v673_v23 = vor.u32 %v725_v19, %v672_v18  ;;  %v617_v18 = vor.u32 %v712_v11, %v616_v10  ;;  %v715_v19 = vld [vmem:[#allocation2 + $0x8c] sm:$0xf]  ;;  %v820_v11 = vmov 0  }
  0xae   :  { %v90_v25 = vsel %vm86_vm0, %v82_v24, -inf  ;;  %746 = vset.pattern.permute.xlu0 %v820_v11 }
  0xaf   :  { %91 = vmax.xlane.f32.xlu0 %v90_v25  ;;  %428 = vmatpush.bf16.msra.mxu3 %v673_v23  ;;  %v600_v23 = vld [vmem:[#allocation2 + $0x40] sm:$0xf] }
 0x11a   :  { %v916_v28 = vpop.xlane.xlu0 %88 }
 0x11b   :  { %vm93_vm1 = vcmp.eq.f32.partialorder %v79_v21, %v916_v28 }
 0x11c   :  { %v95_v29 = vsel %vm93_vm1, %v914_v27, 4 }
 0x11d   :  { %v97_v30 = vsel %vm86_vm0, %v95_v29, 2147483647  ;;  %v721_v29 = vld [vmem:[#allocation2 + $0xb4] sm:$0xf0] }
 0x11e   :  { %v99_v31 = vshra.s32 %v97_v30, 16  ;;  %v98_v38 = vand.u32 65535, %v97_v30  ;;  %v664_v30 = vld [vmem:[#allocation2 + $0xc0] sm:$0xf] }
 0x120   :  { %v101_v32 = vcvt.s32.f32 %v99_v31  ;;  %v100_v40 = vcvt.s32.f32 %v98_v38  ;;  %v648_v38 = vld [vmem:[#allocation2 + $0xa0] sm:$0xf] }
 0x122   :  { %102 = vmin.xlane.f32.xlu1 %v101_v32  ;;  %v921_v33 = vpop.xlane.xlu0 %91 }
 0x123   :  { %vm94_vm2 = vcmp.eq.f32.partialorder %v82_v24, %v921_v33 }
 0x124   :  { %v96_v34 = vsel %vm94_vm2, %v914_v27, 4 }
 0x125   :  { %v112_v35 = vsel %vm86_vm0, %v96_v34, 2147483647  ;;  %v714_v34 = vld [vmem:[#allocation2 + $0x84] sm:$0xf] }
 0x126   :  { %v114_v36 = vshra.s32 %v112_v35, 16  ;;  %v113_v42 = vand.u32 65535, %v112_v35  ;;  %v634_v35 = vld [vmem:[#allocation2 + $0x90] sm:$0xf0] }
 0x128   :  { %v116_v37 = vcvt.s32.f32 %v114_v36  ;;  %v115_v44 = vcvt.s32.f32 %v113_v42  ;;  %v637_v42 = vor.u32 %v714_v34, %v634_v35  ;;  %v570_v34 = vld [vmem:[#allocation2 + $0x10] sm:$0xf0] }
 0x12a   :  { %117 = vmin.xlane.f32.xlu1 %v116_v37 }
 0x195   :  { %v103_v39 = vpop.xlane.xlu1 %102 }
 0x196   :  { %vm104_vm3 = vcmp.eq.f32.partialorder %v101_v32, %v103_v39  ;;  %v109_v46 = vcvt.f32.s32 %v103_v39  ;;  %v724_v32 = vld [vmem:[#allocation2 + $0xcc] sm:$0xf0] }
 0x197   :  { %v105_v41 = vsel %vm104_vm3, %v100_v40, inf  ;;  %v665_v36 = vor.u32 %v724_v32, %v664_v30  ;;  %v720_v39 = vld [vmem:[#allocation2 + $0xac] sm:$0xf0]  ;;  %v640_v40 = vld [vmem:[#allocation2 + $0x88] sm:$0xf]  ;;  %v589_v30 = vor.u32 %v702_v15, %v586_v17 }
 0x198   :  { %106 = vmin.xlane.f32.xlu2 %v105_v41  ;;  %v110_v48 = vshll.u32 %v109_v46, 16  ;;  %v717_v41 = vld [vmem:[#allocation2 + $0x94] sm:$0xf0]  ;;  %v727_v46 = vld [vmem:[#allocation2 + $0xec] sm:$0xf] }
 0x19d   :  { %v118_v43 = vpop.xlane.xlu1 %117 }
 0x19e   :  { %vm119_vm4 = vcmp.eq.f32.partialorder %v116_v37, %v118_v43  ;;  %v124_v51 = vcvt.f32.s32 %v118_v43  ;;  %v657_v37 = vor.u32 %v721_v29, %v656_v26  ;;  %v710_v43 = vld [vmem:[#allocation2 + $0x64] sm:$0xf]  ;;  %v705_v26 = vld [vmem:[#allocation2 + $0x34] sm:$0xf0] }
 0x19f   :  { %v120_v45 = vsel %vm119_vm4, %v115_v44, inf  ;;  %v618_v44 = vld [vmem:[#allocation2 + $0x70] sm:$0xf0] }
 0x1a0   :  { %121 = vmin.xlane.f32.xlu2 %v120_v45  ;;  %v125_v56 = vshll.u32 %v124_v51, 16  ;;  %v649_v45 = vor.u32 %v720_v39, %v648_v38  ;;  %429 = vmatpush.bf16.msra.mxu3 %v657_v37  ;;  %v716_v51 = vld [vmem:[#allocation2 + $0x8c] sm:$0xf0]  ;;  %v626_v37 = vld [vmem:[#allocation2 + $0x78] sm:$0xf0] }
 0x20b   :  { %v107_v47 = vpop.xlane.xlu2 %106 }
 0x20c   :  { %v108_v49 = vcvt.f32.s32 %v107_v47  ;;  %v690_v47 = vld [vmem:[#allocation2 + $0xf8] sm:$0xf0] }
 0x20e   :  { %v111_v50 = vadd.s32 %v110_v48, %v108_v49  ;;  %v641_v48 = vor.u32 %v717_v41, %v640_v40  ;;  %v624_v49 = vld [vmem:[#allocation2 + $0x68] sm:$0xf]  ;;  %v584_v40 = vld [vmem:[#allocation2 + $0x20] sm:$0xf] }
 0x20f   :  { %v576_v41 = vld [vmem:[#allocation2 + $0x8] sm:$0xf] }
 0x210   :  { %vm127_vm5 = vcmp.eq.s32.totalorder %v914_v27, %v111_v50  ;;  %v632_v50 = vld [vmem:[#allocation2 + $0x80] sm:$0xf]  ;;  %430 = vmatpush.bf16.msra.mxu3 %v641_v48 }
 0x211   :  { %v928_v53 = vsel %vm127_vm5, 1.0, %v817_v52 }
 0x212   :  { %vm133_vm6 = vcmp.gt.f32.partialorder %v928_v53, 0.0 }
 0x213   :  { %v122_v54 = vpop.xlane.xlu2 %121  ;;  %v135_v55 = vsel %vm133_vm6, -inf, %v79_v21  ;;  %v650_v21 = vld [vmem:[#allocation2 + $0xb0] sm:$0xf0] }
 0x214   :  { %v123_v57 = vcvt.f32.s32 %v122_v54  ;;  %v137_v58 = vsel %vm86_vm0, %v135_v55, -inf  ;;  %v653_v31 = vor.u32 %v718_v20, %v650_v21  ;;  %v693_v54 = vor.u32 %v727_v46, %v690_v47  ;;  %v642_v20 = vld [vmem:[#allocation2 + $0x98] sm:$0xf0]  ;;  %v707_v46 = vld [vmem:[#allocation2 + $0x4c] sm:$0xf] }
 0x215   :  { %138 = vmax.xlane.f32.xlu0 %v137_v58  ;;  %v621_v58 = vor.u32 %v710_v43, %v618_v44  ;;  %v645_v32 = vor.u32 %v715_v19, %v642_v20  ;;  %v610_v47 = vld [vmem:[#allocation2 + $0x58] sm:$0xf0] }
 0x216   :  { %v126_v59 = vadd.s32 %v125_v56, %v123_v57  ;;  %415 = vmatpush.bf16.msra.mxu2 %v653_v31  ;;  %v723_v56 = vld [vmem:[#allocation2 + $0xcc] sm:$0xf]  ;;  %v674_v57 = vld [vmem:[#allocation2 + $0xd8] sm:$0xf0]  ;;  %441 = vmatpush.bf16.msrb.mxu0 %v693_v54  ;;  %v698_v31 = vld [vmem:[#allocation2 + $0x4] sm:$0xf] }
 0x217   :  { %v573_v43 = vor.u32 %v698_v31, %v570_v34  ;;  %v697_v54 = vld [vmem:[%s993_s0] sm:$0xff]  ;;  %s822_s0 = smov [#allocation5]  }
 0x218   :  { %vm128_vm7 = vcmp.eq.s32.totalorder %v914_v27, %v126_v59  ;;  %v706_v59 = vld [vmem:[#allocation2 + $0x44] sm:$0xf] }
 0x219   :  { %v934_v60 = vsel %vm128_vm7, 1.0, %v817_v52 }
 0x21a   :  { %vm134_vm8 = vcmp.gt.f32.partialorder %v934_v60, 0.0  ;;  %416 = vmatpush.bf16.msra.mxu2 %v637_v42  ;;  %v701_v42 = vld [vmem:[#allocation2 + $0x14] sm:$0xf0] }
 0x21b   :  { %v136_v61 = vsel %vm134_vm8, -inf, %v82_v24  ;;  %v728_v24 = vld [vmem:[#allocation2 + $0xec] sm:$0xf0] }
 0x21c   :  { %v140_v62 = vsel %vm86_vm0, %v136_v61, -inf  ;;  %v681_v25 = vor.u32 %v728_v24, %v680_v22  ;;  %v708_v24 = vld [vmem:[#allocation2 + $0x4c] sm:$0xf0] }
 0x21d   :  { %141 = vmax.xlane.f32.xlu1 %v140_v62  ;;  %v602_v62 = vld [vmem:[#allocation2 + $0x50] sm:$0xf0]  ;;  %v601_v35 = vor.u32 %v708_v24, %v600_v23 }
 0x21e   :  { %399 = vmatpush.bf16.msra.mxu1 %v681_v25  ;;  %417 = vmatpush.bf16.msra.mxu2 %v621_v58  ;;  %v605_v14 = vor.u32 %v706_v59, %v602_v62  ;;  %v592_v25 = vld [vmem:[#allocation2 + $0x28] sm:$0xf]  ;;  %v703_v58 = vld [vmem:[#allocation2 + $0x2c] sm:$0xf]  ;;  %v594_v59 = vld [vmem:[#allocation2 + $0x38] sm:$0xf0] }
 0x21f   :  { %v593_v39 = vor.u32 %v705_v26, %v592_v25  ;;  %v699_v62 = vld [vmem:[#allocation2 + $0xc] sm:$0xf] }
 0x222   :  { %400 = vmatpush.bf16.msra.mxu1 %v665_v36  ;;  %418 = vmatpush.bf16.msra.mxu2 %v605_v14  ;;  %v711_v36 = vld [vmem:[#allocation2 + $0x6c] sm:$0xf] }
 0x223   :  { %v629_v44 = vor.u32 %v711_v36, %v626_v37  ;;  %v821_v37 = vmov 3  }
 0x226   :  { %401 = vmatpush.bf16.msra.mxu1 %v649_v45  ;;  %419 = vmatpush.bf16.msra.mxu2 %v589_v30 }
 0x22a   :  { %420 = vmatpush.bf16.msra.mxu2 %v573_v43 }
 0x22d   :  { %421 = vmatmul.bf16.vlgmr.msra.gmra.mxu2 %v697_v54 }
 0x288   :  { %v938_v63 = vpop.xlane.xlu0 %138 }
 0x289   :  { %vm143_vm9 = vcmp.eq.f32.partialorder %v135_v55, %v938_v63  ;;  %v713_v55 = vld [vmem:[#allocation2 + $0x74] sm:$0xf0] }
 0x28a   :  { %v145_v0 = vsel %vm143_vm9, %v914_v27, 4  ;;  %v625_v9 = vor.u32 %v713_v55, %v624_v49 }
 0x28b   :  { %v943_v1 = vsel %vm86_vm0, %v145_v0, 2147483647  ;;  %v633_v0 = vor.u32 %v716_v51, %v632_v50  ;;  %v577_v50 = vor.u32 %v701_v42, %v576_v41  ;;  %v700_v51 = vld [vmem:[#allocation2 + $0xc] sm:$0xf0] }
 0x28c   :  { %v149_v2 = vshra.s32 %v943_v1, 16  ;;  %431 = vmatpush.bf16.msra.mxu3 %v625_v9  ;;  %v819_v9 = vmov 1  }
 0x28d   :  { %402 = vmatpush.bf16.msra.mxu1 %v633_v0  ;;  %v578_v0 = vld [vmem:[#allocation2 + $0x18] sm:$0xf0]  ;;  %747 = vset.pattern.permute.xlu2 %v819_v9 }
 0x28e   :  { %v946_v3 = vcvt.s32.f32 %v149_v2  ;;  %v719_v2 = vld [vmem:[#allocation2 + $0xac] sm:$0xf] }
 0x290   :  { %v948_v4 = vpop.xlane.xlu1 %141  ;;  %152 = vmin.xlane.f32.xlu2 %v946_v3 }
 0x291   :  { %vm144_vm10 = vcmp.eq.f32.partialorder %v136_v61, %v948_v4  ;;  %v677_v61 = vor.u32 %v723_v56, %v674_v57  ;;  %403 = vmatpush.bf16.msra.mxu1 %v617_v18  ;;  %v613_v56 = vor.u32 %v707_v46, %v610_v47 }
 0x292   :  { %v146_v5 = vsel %vm144_vm10, %v914_v27, 4 }
 0x293   :  { %v954_v6 = vsel %vm86_vm0, %v146_v5, 2147483647  ;;  %v658_v5 = vld [vmem:[#allocation2 + $0xb8] sm:$0xf0]  ;;  %442 = vmatpush.bf16.msrb.mxu0 %v677_v61  ;;  %v455_v61 = vld [vmem:[%s997_s4] sm:$0xf] }
 0x294   :  { %v164_v7 = vshra.s32 %v954_v6, 16  ;;  %v661_v16 = vor.u32 %v719_v2, %v658_v5  ;;  %v163_v38 = vand.u32 65535, %v954_v6  ;;  %v568_v6 = vld [vmem:[#allocation2] sm:$0xf]  ;;  %v581_v2 = vor.u32 %v699_v62, %v578_v0  ;;  %s543_s4 = sshll.u32 %s822_s0, 4  ;;  %s544_s4 = int_to_ptr.vmem [resolvable:$true] %s543_s4 }
 0x295   :  { %404 = vmatpush.bf16.msra.mxu1 %v601_v35  ;;  %v569_v57 = vor.u32 %v700_v51, %v568_v6  ;;  %v183_v5 = vsub.f32 %v938_v63, %v916_v28 }
 0x296   :  { %v957_v8 = vcvt.s32.f32 %v164_v7  ;;  %v148_v7 = vand.u32 65535, %v943_v1  ;;  %v609_v1 = vor.u32 %v709_v13, %v608_v12  ;;  %v165_v49 = vcvt.s32.f32 %v163_v38 }
 0x297   :  { %443 = vmatpush.bf16.msrb.mxu0 %v661_v16  ;;  %v185_v10 = vmul.f32 1.442695, %v183_v5  ;;  %v184_v12 = vsub.f32 %v948_v4, %v921_v33 }
 0x298   :  { %167 = vmin.xlane.f32.xlu0 %v957_v8  ;;  %v150_v22 = vcvt.s32.f32 %v148_v7  ;;  %432 = vmatpush.bf16.msra.mxu3 %v609_v1  ;;  %v818_v7 = vmov 2  }
 0x299   :  { %748 = vset.pattern.permute.xlu1 %v818_v7  ;;  %754 = vpow2.f32 %v185_v10  ;;  %v187_v13 = vmul.f32 1.442695, %v184_v12 }
 0x29b   :  { %444 = vmatpush.bf16.msrb.mxu0 %v645_v32  ;;  %756 = vpow2.f32 %v187_v13 }
 0x29c   :  { %433 = vmatpush.bf16.msra.mxu3 %v593_v39 }
 0x29f   :  { %445 = vmatpush.bf16.msrb.mxu0 %v629_v44  ;;  %v755_v14 = vpop.eup %754 }
 0x2a0   :  { %434 = vmatpush.bf16.msra.mxu3 %v577_v50  ;;  %v189_v15 = vadd.f32 1.0, %v755_v14 }
 0x2a1   :  { %v757_v16 = vpop.eup %756 }
 0x2a2   :  { %758 = vrcp.f32 %v189_v15  ;;  %v190_v28 = vadd.f32 1.0, %v757_v16 }
 0x2a3   :  { %446 = vmatpush.bf16.msrb.mxu0 %v613_v56  ;;  %435 = vmatmul.bf16.vlgmr.msra.gmra.mxu3 %v697_v54 }
 0x2a4   :  { %760 = vrcp.f32 %v190_v28 }
 0x2a8   :  { %v759_v20 = vpop.eup %758 }
 0x2a9   :  { %v195_v23 = vmul.f32 %v759_v20, %v755_v14  ;;  %v193_v4 = vmul.f32 %v759_v20, %v928_v53 }
 0x2aa   :  { %v761_v30 = vpop.eup %760 }
 0x2ab   :  { %v196_v32 = vmul.f32 %v761_v30, %v757_v16  ;;  %v194_v35 = vmul.f32 %v761_v30, %v934_v60 }
 0x303   :  { %v961_v21 = vpop.xlane.xlu2 %152 }
 0x304   :  { %vm154_vm11 = vcmp.eq.f32.partialorder %v946_v3, %v961_v21  ;;  %v704_v3 = vld [vmem:[#allocation2 + $0x2c] sm:$0xf0]  ;;  %v159_v17 = vcvt.f32.s32 %v961_v21 }
 0x305   :  { %v155_v29 = vsel %vm154_vm11, %v150_v22, inf  ;;  %v585_v45 = vor.u32 %v704_v3, %v584_v40  ;;  %v422_v40 = vpop.f32.mrf.mxu2 }
 0x306   :  { %156 = vmin.xlane.f32.xlu1 %v155_v29  ;;  %v160_v18 = vshll.u32 %v159_v17, 16 }
 0x307   :  { %405 = vmatpush.bf16.msra.mxu1 %v585_v45 }
 0x30b   :  { %v966_v48 = vpop.xlane.xlu0 %167  ;;  %406 = vmatpush.bf16.msra.mxu1 %v569_v57 }
 0x30c   :  { %vm169_vm12 = vcmp.eq.f32.partialorder %v957_v8, %v966_v48  ;;  %v597_v8 = vor.u32 %v703_v58, %v594_v59  ;;  %v174_v1 = vcvt.f32.s32 %v966_v48 }
 0x30d   :  { %v170_v55 = vsel %vm169_vm12, %v165_v49, inf  ;;  %v424_v47 = vpop.f32.mrf.mxu2 }
 0x30e   :  { %171 = vmin.xlane.f32.xlu2 %v170_v55  ;;  %407 = vmatmul.bf16.vlgmr.msra.gmra.mxu1 %v697_v54  ;;  %v175_v26 = vshll.u32 %v174_v1, 16 }
 0x30f   :  { %694 = vmatpush.msk.msrb.mxu1 %vm472_vm13, %v455_v61  ;;  %447 = vmatpush.bf16.msrb.mxu0 %v597_v8 }
 0x313   :  { %448 = vmatpush.bf16.msrb.mxu0 %v581_v2 }
 0x316   :  { %449 = vmatmul.bf16.vlgmr.msrb.gmra.mxu0 %v697_v54 }
 0x326   :  { %v436_v3 = vpop.f32.mrf.mxu3 }
 0x32e   :  { %v438_v49 = vpop.f32.mrf.mxu3 }
 0x379   :  { %v157_v63 = vpop.xlane.xlu1 %156 }
 0x37a   :  { %v158_v19 = vcvt.f32.s32 %v157_v63 }
 0x37c   :  { %v161_v22 = vadd.s32 %v160_v18, %v158_v19 }
 0x37e   :  { %vm177_vm14 = vcmp.eq.s32.totalorder %v914_v27, %v161_v22 }
 0x37f   :  { %v560_v33 = vsel %vm177_vm14, 1.0, %v817_v52 }
 0x380   :  { %v197_v24 = vmul.f32 %v560_v33, %v195_v23 }
 0x381   :  { %v172_v25 = vpop.xlane.xlu2 %171 }
 0x382   :  { %v199_v21 = vadd.f32 %v197_v24, %v193_v4  ;;  %v173_v29 = vcvt.f32.s32 %v172_v25 }
 0x384   :  { %v176_v31 = vadd.s32 %v175_v26, %v173_v29  ;;  %512 = vperm.xlu1 %748, %v199_v21   ;;  %458 = vperm.xlu0 %746, %v199_v21  }
 0x385   :  { %695 = vmatmul.msk.f32.vlgmr.msrb.gmra.mxu1 %vm86_vm0, %v199_v21  ;;  %500 = vperm.xlu2 %747, %v199_v21  }
 0x386   :  { %vm178_vm15 = vcmp.eq.s32.totalorder %v914_v27, %v176_v31 }
 0x387   :  { %v561_v34 = vsel %vm178_vm15, 1.0, %v817_v52 }
 0x388   :  { %v198_v53 = vmul.f32 %v561_v34, %v196_v32 }
 0x38a   :  { %v200_v36 = vadd.f32 %v198_v53, %v194_v35 }
 0x38b   :  { %v408_v38 = vpop.f32.mrf.mxu1 }
 0x38c   :  { %749 = vset.pattern.permute.xlu1 %v820_v11  ;;  %752 = vset.pattern.permute.xlu0 %v821_v37 }
 0x38d   :  { %504 = vperm.xlu2 %747, %v200_v36   ;;  %696 = vmatmul.msk.f32.gmra.mxu1 %vm86_vm0, %v200_v36 }
 0x38e   :  { %528 = vperm.xlu0 %752, %v200_v36   ;;  %463 = vperm.xlu1 %749, %v200_v36  }
 0x393   :  { %v410_v52 = vpop.f32.mrf.mxu1  ;;  %v450_v42 = vpop.f32.mrf.mxu0 }
 0x395   :  { %750 = vset.pattern.permute.xlu2 %v818_v7 }
 0x396   :  { %516 = vperm.xlu2 %750, %v200_v36   ;;  %751 = vset.pattern.permute.xlu1 %v821_v37 }
 0x397   :  { %524 = vperm.xlu1 %751, %v199_v21  }
 0x39b   :  { %v452_v58 = vpop.f32.mrf.mxu0 }
 0x3df   :  { %v501_v27 = vpop.permute.xlu2 %500 }
 0x3e0   :  { %v507_v48 = vmul.f32 %v501_v27, %v422_v40 }
 0x3e7   :  { %v505_v60 = vpop.permute.xlu2 %504 }
 0x3e8   :  { %v508_v55 = vmul.f32 %v505_v60, %v424_v47 }
 0x3f0   :  { %v517_v50 = vpop.permute.xlu2 %516 }
 0x3f1   :  { %v520_v61 = vmul.f32 %v517_v50, %v438_v49 }
 0x3f6   :  { %v513_v39 = vpop.permute.xlu1 %512  ;;  %v459_v43 = vpop.permute.xlu0 %458 }
 0x3f7   :  { %v466_v45 = vmul.f32 %v459_v43, %v408_v38  ;;  %v519_v8 = vmul.f32 %v513_v39, %v436_v3 }
 0x400   :  { %v464_v41 = vpop.permute.xlu1 %463  ;;  %v529_v59 = vpop.permute.xlu0 %528 }
 0x401   :  { %v467_v6 = vmul.f32 %v464_v41, %v410_v52  ;;  %v532_v2 = vmul.f32 %v529_v59, %v452_v58 }
 0x402   :  { %v493_v44 = vpop.f32.mrf.mxu1 }
 0x403   :  { %v494_v46 = vadd.f32 %v493_v44, %v466_v45 }
 0x405   :  { %v509_v56 = vadd.f32 %v507_v48, %v494_v46 }
 0x407   :  { %v521_v5 = vadd.f32 %v519_v8, %v509_v56 }
 0x409   :  { %v525_v51 = vpop.permute.xlu1 %524 }
 0x40a   :  { %v496_v54 = vpop.f32.mrf.mxu1  ;;  %v531_v62 = vmul.f32 %v525_v51, %v450_v42 }
 0x40b   :  { %v497_v57 = vadd.f32 %v496_v54, %v467_v6 }
 0x40c   :  { %v533_v9 = vadd.f32 %v531_v62, %v521_v5 }
 0x40d   :  { %v510_v0 = vadd.f32 %v508_v55, %v497_v57 }
 0x40f   :  { %v522_v7 = vadd.f32 %v520_v61, %v510_v0 }
 0x411   :  { %v534_v10 = vadd.f32 %v532_v2, %v522_v7 }
 0x413   :  { %v733_v11 = vpack.c.bf16 %v534_v10, %v533_v9 }
 0x415   :  { %734 = vst [vmem:[#allocation5] sm:$0xff] %v733_v11  }
 0x416   :  { %551 = dma.vmem_to_hbm [thread:$0]  %s544_s4, 128, %s546_s13, [#allocation4], %s823_s14, %s823_s14, %s824_s15  }
 0x417   :  { %812 = dma.done.wait [#allocation4], 128  }
 0x418   :  { %813 = vsyncadd [#allocation4], 4294967168 }
 0x419   :  { %556 = vsyncpa [#allocation3], 1 }
 0x41a   :  { %557 = vsyncpa [#allocation4], 1 }

</bundles_post_ra>
